<compile_context>
chip_gen: v7x
topology: tpu7x:2x2x1
jax: 0.10.0
libtpu: 0.0.40
codegen_flags: <defaults>
</compile_context>

<pallas_src>
import jax
import jax.numpy as jnp
from jax.experimental import pallas as pl
from jax.experimental.pallas import tpu as pltpu


def _linear_relu_kernel(x_ref, w_ref, b_ref, o_ref):
    # x_ref: (tm, tk) bf16   w_ref: (tk, tn) bf16   b_ref: (1, tn) f32
    # o_ref: (tm, tn) f32  — accumulator (block index constant across k)
    k = pl.program_id(2)

    @pl.when(k == 0)
    def _():
        o_ref[...] = jnp.zeros_like(o_ref)

    o_ref[...] += jnp.dot(x_ref[...], w_ref[...],
                          preferred_element_type=jnp.float32)

    @pl.when(k == pl.num_programs(2) - 1)
    def _():
        o_ref[...] = jnp.maximum(o_ref[...] + b_ref[...], 0.0)


def _round_up(x, m):
    return ((x + m - 1) // m) * m


def _choose_tile(dim, cap, align):
    """Minimal-padding tile <= cap, multiple of align."""
    cap = _round_up(cap, align)
    if dim >= cap:
        n_chunks = -(-dim // cap)
        return min(_round_up(-(-dim // n_chunks), align), cap)
    return min(_round_up(dim, align), cap)


def _chip_config():
    """(cap_mn, cap_k, vmem_limit_bytes) keyed on TPU generation."""
    try:
        kind = jax.devices()[0].device_kind.lower()
    except Exception:  # pragma: no cover - defensive fallback
        kind = ""
    if "v7" in kind:
        # 64 MiB physical VMEM per TC: keep double-buffered footprint modest.
        return 1024, 512, 48 << 20
    if "v6" in kind:
        return 1024, 512, 64 << 20
    # v5e (16 MiB default scoped) and anything unknown: conservative tiles.
    return 512, 512, 32 << 20


def part_forward(x, weight, bias, *, tile_m=None, tile_n=None, tile_k=None):
    """y = relu(x @ weight.T + bias) via a single Pallas kernel.

    x:      (M, K) float32
    weight: (N, K) float32   (nn.Linear convention)
    bias:   (N,)   float32
    Returns (M, N) float32.
    """
    M, K = x.shape
    N, K2 = weight.shape
    assert K == K2

    cap_mn, cap_k, vmem_limit = _chip_config()
    is_v7 = False
    try:
        is_v7 = "v7" in jax.devices()[0].device_kind.lower()
    except Exception:  # pragma: no cover
        pass

    # bf16 compute: sublane packing needs tile_m multiple of 16; lanes 128.
    if tile_m is None:
        tile_m = _choose_tile(M, cap_mn, 16)
    if tile_n is None:
        tile_n = _choose_tile(N, cap_mn, 128)
    if tile_k is None:
        tile_k = _choose_tile(K, cap_k, 128)

    # v7x dual-TC: if the (i, j) grid collapsed to one tile, split N so both
    # cores (parallel axes only) get work.
    if (is_v7 and tile_n >= 256
            and _round_up(M, tile_m) // tile_m == 1
            and _round_up(N, tile_n) // tile_n == 1):
        tile_n = _choose_tile(N, tile_n // 2, 128)

    Mp = _round_up(M, tile_m)
    Np = _round_up(N, tile_n)
    Kp = _round_up(K, tile_k)

    # Cast to bf16 for MXU-native matmul (f32 accumulation in-kernel) and
    # pre-transpose the weight once to (K, N) so the kernel needs no
    # per-tile transpose.
    xb = x.astype(jnp.bfloat16)
    wt = weight.T.astype(jnp.bfloat16)          # (K, N)

    # Zero-pad ragged dims only when needed (padded K contributes 0, padded
    # M rows / N cols are sliced off below).
    if (Mp, Kp) != (M, K):
        xb = jnp.pad(xb, ((0, Mp - M), (0, Kp - K)))
    if (Kp, Np) != (K, N):
        wt = jnp.pad(wt, ((0, Kp - K), (0, Np - N)))
    b2 = bias if Np == N else jnp.pad(bias, (0, Np - N))
    b2 = b2.reshape(1, Np).astype(jnp.float32)

    grid = (Mp // tile_m, Np // tile_n, Kp // tile_k)

    # bytes_accessed including re-reads: x read once per N-tile, W once per
    # M-tile (bf16 inputs, f32 bias/out).
    cost = pl.CostEstimate(
        flops=2 * Mp * Np * Kp,
        transcendentals=0,
        bytes_accessed=(Mp * Kp * grid[1] * 2
                        + Kp * Np * grid[0] * 2
                        + Np * 4
                        + Mp * Np * 4))

    out = pl.pallas_call(
        _linear_relu_kernel,
        out_shape=jax.ShapeDtypeStruct((Mp, Np), jnp.float32),
        grid_spec=pltpu.PrefetchScalarGridSpec(
            num_scalar_prefetch=0,
            grid=grid,
            in_specs=[
                pl.BlockSpec((tile_m, tile_k), lambda i, j, k: (i, k)),  # x
                pl.BlockSpec((tile_k, tile_n), lambda i, j, k: (k, j)),  # W^T
                pl.BlockSpec((1, tile_n), lambda i, j, k: (0, j)),       # bias
            ],
            out_specs=pl.BlockSpec((tile_m, tile_n), lambda i, j, k: (i, j)),
        ),
        compiler_params=pltpu.CompilerParams(
            dimension_semantics=("parallel", "parallel", "arbitrary"),
            vmem_limit_bytes=vmem_limit),
        cost_estimate=cost,
    )(xb, wt, b2)

    if (Mp, Np) != (M, N):
        out = out[:M, :N]
    return out
    # TODO(synk): if DMA is still exposed after the tile bump on v6e/v7x, try
    # pipeline_mode=pl.Buffered(3) on the x/W BlockSpecs.


def _init_linear_params(key, in_size, out_size):
    # Deterministic init mimicking nn.Linear's default (uniform +/- 1/sqrt(in)).
    kw, kb = jax.random.split(key)
    bound = 1.0 / jnp.sqrt(jnp.float32(in_size))
    weight = jax.random.uniform(kw, (out_size, in_size), jnp.float32,
                                minval=-bound, maxval=bound)
    bias = jax.random.uniform(kb, (out_size,), jnp.float32,
                              minval=-bound, maxval=bound)
    return weight, bias


if __name__ == "__main__":
    key = jax.random.PRNGKey(0)
    k_x, k_p = jax.random.split(key)

    batch, in_size, out_size = 8, 32, 32
    x = jax.random.normal(k_x, (batch, in_size), jnp.float32)
    weight, bias = _init_linear_params(k_p, in_size, out_size)

    y = part_forward(x, weight, bias)
    y = jax.block_until_ready(y)

    # Reference check in plain JAX (f32); bf16 compute => looser tolerance.
    y_ref = jnp.maximum(x @ weight.T + bias, 0.0)
    assert y.shape == (batch, out_size)
    assert y.dtype == jnp.float32
    assert jnp.allclose(y, y_ref, atol=2e-2, rtol=2e-2)

    print("KERNEL_OK")
</pallas_src>

<mosaic_0001>
module attributes {stable_mosaic.version = 11 : i64} {
  func.func @_linear_relu_kernel(%arg0: i32, %arg1: i32, %arg2: i32, %arg3: memref<16x128xbf16, #tpu.memory_space<vmem>>, %arg4: memref<128x128xbf16, #tpu.memory_space<vmem>>, %arg5: memref<1x128xf32, #tpu.memory_space<vmem>>, %arg6: memref<16x128xf32, #tpu.memory_space<vmem>>) attributes {dimension_semantics = [#tpu.dimension_semantics<parallel>, #tpu.dimension_semantics<parallel>, #tpu.dimension_semantics<arbitrary>], iteration_bounds = array<i64: 1, 1, 1>, scalar_prefetch = 0 : i64, scratch_operands = 0 : i64, tpu.core_type = #tpu.core_type<tc>, window_params = [{transform_indices = @transform_0, window_bounds = array<i64: 16, 128>}, {transform_indices = @transform_1, window_bounds = array<i64: 128, 128>}, {transform_indices = @transform_2, window_bounds = array<i64: 1, 128>}, {transform_indices = @transform_3, window_bounds = array<i64: 16, 128>}]} {
    %c0_i32 = arith.constant 0 : i32
    %0 = arith.cmpi eq, %arg2, %c0_i32 : i32
    %1 = arith.extui %0 : i1 to i32
    %c0_i32_0 = arith.constant 0 : i32
    %2 = arith.cmpi ne, %1, %c0_i32_0 : i32
    scf.if %2 {
      %cst_10 = arith.constant 0.000000e+00 : f32
      %12 = vector.broadcast %cst_10 : f32 to vector<16x128xf32>
      %c0_11 = arith.constant 0 : index
      %c0_12 = arith.constant 0 : index
      %13 = vector.load %arg6[%c0_11, %c0_12] : memref<16x128xf32, #tpu.memory_space<vmem>>, vector<16x128xf32>
      tpu.vector_store %arg6[%c0_11, %c0_12], %12 {strides = array<i32>} : memref<16x128xf32, #tpu.memory_space<vmem>>, vector<16x128xf32>,
    } else {
    }
    %c0 = arith.constant 0 : index
    %c0_1 = arith.constant 0 : index
    %3 = vector.load %arg6[%c0, %c0_1] : memref<16x128xf32, #tpu.memory_space<vmem>>, vector<16x128xf32>
    %c0_2 = arith.constant 0 : index
    %c0_3 = arith.constant 0 : index
    %4 = vector.load %arg3[%c0_2, %c0_3] : memref<16x128xbf16, #tpu.memory_space<vmem>>, vector<16x128xbf16>
    %c0_4 = arith.constant 0 : index
    %c0_5 = arith.constant 0 : index
    %5 = vector.load %arg4[%c0_4, %c0_5] : memref<128x128xbf16, #tpu.memory_space<vmem>>, vector<128x128xbf16>
    %cst = arith.constant dense<0.000000e+00> : vector<16x128xf32>
    %6 = tpu.matmul %4, %5, %cst {dimension_numbers = #tpu.dot_dimension_numbers<[1], [0], [0], [1], [0, 0, 1, 1], [], []>} : vector<16x128xbf16>, vector<128x128xbf16>, vector<16x128xf32> -> vector<16x128xf32>
    %7 = arith.addf %3, %6 : vector<16x128xf32>
    %c0_6 = arith.constant 0 : index
    %c0_7 = arith.constant 0 : index
    %8 = vector.load %arg6[%c0_6, %c0_7] : memref<16x128xf32, #tpu.memory_space<vmem>>, vector<16x128xf32>
    tpu.vector_store %arg6[%c0_6, %c0_7], %7 {strides = array<i32>} : memref<16x128xf32, #tpu.memory_space<vmem>>, vector<16x128xf32>,
    %c0_i32_8 = arith.constant 0 : i32
    %9 = arith.cmpi eq, %arg2, %c0_i32_8 : i32
    %10 = arith.extui %9 : i1 to i32
    %c0_i32_9 = arith.constant 0 : i32
    %11 = arith.cmpi ne, %10, %c0_i32_9 : i32
    scf.if %11 {
      %c0_10 = arith.constant 0 : index
      %c0_11 = arith.constant 0 : index
      %12 = vector.load %arg6[%c0_10, %c0_11] : memref<16x128xf32, #tpu.memory_space<vmem>>, vector<16x128xf32>
      %c0_12 = arith.constant 0 : index
      %c0_13 = arith.constant 0 : index
      %13 = vector.load %arg5[%c0_12, %c0_13] : memref<1x128xf32, #tpu.memory_space<vmem>>, vector<1x128xf32>
      %14 = vector.broadcast %13 : vector<1x128xf32> to vector<16x128xf32>
      %15 = arith.addf %12, %14 : vector<16x128xf32>
      %cst_14 = arith.constant 0.000000e+00 : f32
      %16 = vector.broadcast %cst_14 : f32 to vector<16x128xf32>
      %17 = arith.maximumf %15, %16 : vector<16x128xf32>
      %c0_15 = arith.constant 0 : index
      %c0_16 = arith.constant 0 : index
      %18 = vector.load %arg6[%c0_15, %c0_16] : memref<16x128xf32, #tpu.memory_space<vmem>>, vector<16x128xf32>
      tpu.vector_store %arg6[%c0_15, %c0_16], %17 {strides = array<i32>} : memref<16x128xf32, #tpu.memory_space<vmem>>, vector<16x128xf32>,
    } else {
    }
    return
  }
  func.func @transform_0(%arg0: i32, %arg1: i32, %arg2: i32) -> (i32, i32) {
    %c0_i32 = arith.constant 0 : i32
    return %arg0, %arg2 : i32, i32
  }
  func.func @transform_1(%arg0: i32, %arg1: i32, %arg2: i32) -> (i32, i32) {
    %c0_i32 = arith.constant 0 : i32
    return %arg2, %arg1 : i32, i32
  }
  func.func @transform_2(%arg0: i32, %arg1: i32, %arg2: i32) -> (i32, i32) {
    %c0_i32 = arith.constant 0 : i32
    %c0_i32_0 = arith.constant 0 : i32
    return %c0_i32, %arg1 : i32, i32
  }
  func.func @transform_3(%arg0: i32, %arg1: i32, %arg2: i32) -> (i32, i32) {
    %c0_i32 = arith.constant 0 : i32
    return %arg0, %arg1 : i32, i32
  }
}

</mosaic_0001>

<bundles_post_ra>
// kernel: tpu_custom_call.1
= control target key start
LH: loop header
LB: loop body
LE: loop exit
PB: predicated region body
PF: predicated region fallthrough
CT: control target
= control target key end

     0   :  { %8 = vsyncpa [#allocation3], 0  ;;  %s402_s0 = inlined_call_operand.hbm [shape: bf16[16,128], index: 0, kind: input, shape index: {}]   ;;  %s403_s1 = inlined_call_operand.hbm [shape: bf16[128,128], index: 1, kind: input, shape index: {}]   ;;  %s404_s2 = inlined_call_operand.vmem [shape: f32[1,128], index: 2, kind: input, shape index: {}]   ;;  %s405_s3 = inlined_call_operand.hbm [shape: f32[16,128], index: 3, kind: output, shape index: {}]  }
   0x1   :  { %9 = vsyncpa [#allocation6], 0 }
   0x2   :  { %10 = vsyncpa [#allocation4], 0  ;;  %s334_s12 = smov [#allocation2]   ;;  %s262_s16 = scalar_lea.hbm %s402_s0, 128 }
   0x3   :  { %s16_s13 = sshll.u32 %s334_s12, 4  ;;  %p263_p0 = scmp.ne.s32.totalorder %s402_s0, %s262_s16  ;;  %s17_s13 = int_to_ptr.vmem [resolvable:$true] %s16_s13 }
   0x4   :  { %p266_p1 = scmp.lt.u32.totalorder %s262_s16, %s402_s0 }
   0x6   :  { %p268_p2 = pnand %p266_p1, %p263_p0 }
   0x8   :  { %271 = shalt.err (!%p268_p2)
}
   0x9   :  { %s272_s21 = scalar_lea.vmem %s17_s13, 128  ;;  %p277_p4 = scmp.lt.s32.totalorder %s17_s13, %s17_s13 }
   0xa   :  { %p273_p3 = scmp.ne.s32.totalorder %s17_s13, %s272_s21  ;;  %p278_p5 = scmp.lt.s32.totalorder %s272_s21, %s272_s21 }
   0xc   :  { %p279_p6 = por %p278_p5, %p277_p4 }
   0xe   :  { %p280_p7 = pnand %p279_p6, %p273_p3 }
  0x10   :  { %283 = shalt.err (!%p280_p7)
}
  0x11   :  { %s335_s22 = smov 64   ;;  %s336_s23 = smov 4  }
  0x12   :  { %22 = dma.hbm_to_vmem [thread:$0]  %s402_s0, 128, %s17_s13, [#allocation3], %s335_s22, %s335_s22, %s336_s23  }
  0x13   :  { %s337_s26 = smov [#allocation5]   ;;  %s284_s30 = scalar_lea.hbm %s403_s1, 1024 }
  0x14   :  { %s28_s27 = sshll.u32 %s337_s26, 4  ;;  %p285_p8 = scmp.ne.s32.totalorder %s403_s1, %s284_s30  ;;  %s29_s27 = int_to_ptr.vmem [resolvable:$true] %s28_s27 }
  0x15   :  { %p288_p9 = scmp.lt.u32.totalorder %s284_s30, %s403_s1 }
  0x17   :  { %p290_p10 = pnand %p288_p9, %p285_p8 }
  0x19   :  { %293 = shalt.err (!%p290_p10)
}
  0x1a   :  { %s294_s8 = scalar_lea.vmem %s29_s27, 1024  ;;  %p299_p12 = scmp.lt.s32.totalorder %s29_s27, %s29_s27 }
  0x1b   :  { %p295_p11 = scmp.ne.s32.totalorder %s29_s27, %s294_s8  ;;  %p300_p13 = scmp.lt.s32.totalorder %s294_s8, %s294_s8 }
  0x1d   :  { %p301_p0 = por %p300_p13, %p299_p12 }
  0x1f   :  { %p302_p1 = pnand %p301_p0, %p295_p11 }
  0x21   :  { %305 = shalt.err (!%p302_p1)
}
  0x22   :  { %34 = dma.hbm_to_vmem [thread:$0]  %s403_s1, 1024, %s29_s27, [#allocation6], %s335_s22, %s335_s22, %s336_s23  }
  0x23   :  { %328 = dma.done.wait [#allocation3], 128  }
  0x24   :  { %329 = vsyncadd [#allocation3], 4294967168 }
  0x25   :  { %330 = dma.done.wait [#allocation6], 1024  }
  0x26   :  { %331 = vsyncadd [#allocation6], 4294966272  ;;  %v338_v0 = vmov 0.0   ;;  %vm339_vm0 = vmmov 0   ;;  %v253_v1 = vld [vmem:[#allocation5] sm:$0xff]   ;;  %v254_v2 = vld [vmem:[#allocation5 + $0x8] sm:$0xff]  }
  0x27   :  { %224 = vmatprep.subr.bf16.mxu0 %v338_v0  ;;  %240 = vmatprep.mubr.msk.bf16.mxu0 %vm339_vm0, %v338_v0  ;;  %v255_v3 = vld [vmem:[#allocation5 + $0x10] sm:$0xff]   ;;  %v256_v4 = vld [vmem:[#allocation5 + $0x18] sm:$0xff]   ;;  %v257_v5 = vld [vmem:[#allocation5 + $0x20] sm:$0xff]   ;;  %s340_s11 = smov [#allocation7]  }
  0x28   :  { %225 = vmatpush3.bf16.msra.mxu0 %v253_v1  ;;  %v258_v6 = vld [vmem:[#allocation5 + $0x28] sm:$0xff]   ;;  %v259_v7 = vld [vmem:[#allocation5 + $0x30] sm:$0xff]   ;;  %v260_v8 = vld [vmem:[#allocation5 + $0x38] sm:$0xff]   ;;  %s192_s12 = sshll.u32 %s340_s11, 4  ;;  %s193_s12 = int_to_ptr.vmem [resolvable:$true] %s192_s12 }
  0x29   :  { %226 = vmatprep.subr.bf16.mxu0 %v338_v0  ;;  %v261_v9 = vld [vmem:[#allocation2] sm:$0xff]   ;;  %s306_s13 = scalar_lea.vmem %s193_s12, 256  ;;  %p311_p3 = scmp.lt.s32.totalorder %s193_s12, %s193_s12 }
  0x2a   :  { %v214_v11 = vld [vmem:[%s404_s2] ss:$0 sm:$0xff]  ;;  %p307_p2 = scmp.ne.s32.totalorder %s193_s12, %s306_s13  ;;  %p312_p4 = scmp.lt.s32.totalorder %s306_s13, %s306_s13 }
  0x2c   :  { %227 = vmatpush3.bf16.msra.mxu0 %v254_v2  ;;  %p313_p5 = por %p312_p4, %p311_p3 }
  0x2d   :  { %228 = vmatprep.subr.bf16.mxu0 %v338_v0 }
  0x2e   :  { %p314_p6 = pnand %p313_p5, %p307_p2 }
  0x30   :  { %229 = vmatpush3.bf16.msra.mxu0 %v255_v3 }
  0x31   :  { %230 = vmatprep.subr.bf16.mxu0 %v338_v0 }
  0x34   :  { %231 = vmatpush3.bf16.msra.mxu0 %v256_v4 }
  0x35   :  { %232 = vmatprep.subr.bf16.mxu0 %v338_v0 }
  0x38   :  { %233 = vmatpush3.bf16.msra.mxu0 %v257_v5 }
  0x39   :  { %234 = vmatprep.subr.bf16.mxu0 %v338_v0 }
  0x3c   :  { %235 = vmatpush3.bf16.msra.mxu0 %v258_v6 }
  0x3d   :  { %236 = vmatprep.subr.bf16.mxu0 %v338_v0 }
  0x40   :  { %237 = vmatpush3.bf16.msra.mxu0 %v259_v7 }
  0x41   :  { %238 = vmatprep.subr.bf16.mxu0 %v338_v0 }
  0x44   :  { %239 = vmatpush3.bf16.msra.mxu0 %v260_v8 }
  0x47   :  { %241 = vmatmul.mubr.bf16.vlgmr.msra.gmra.mrb[0].mxu0 %v261_v9 }
 0x11a   :  { %v158_v10 = vpop.f32.mrb[0].mxu0 }
 0x11b   :  { %v242_v12 = vpop.f32.mrb[1].mxu0  ;;  %v181_v15 = vadd.f32 %v214_v11, %v158_v10 }
 0x11c   :  { %v161_v13 = vpop.f32.mrb[2].mxu0 }
 0x11d   :  { %v243_v14 = vpop.f32.mrb[3].mxu0  ;;  %v182_v16 = vadd.f32 %v214_v11, %v161_v13  ;;  %v183_v17 = vmax.f32 %v181_v15, 0.0 }
 0x11f   :  { %v184_v18 = vmax.f32 %v182_v16, 0.0  ;;  %185 = vst [vmem:[#allocation7] sm:$0xff] %v183_v17 }
 0x121   :  { %186 = vst [vmem:[#allocation7 + $0x8] sm:$0xff] %v184_v18 }
 0x122   :  { %317 = shalt.err (!%p314_p6)
}
 0x123   :  { %s318_s15 = scalar_lea.hbm %s405_s3, 256 }
 0x124   :  { %p319_p7 = scmp.ne.s32.totalorder %s405_s3, %s318_s15  ;;  %p322_p8 = scmp.lt.u32.totalorder %s318_s15, %s405_s3 }
 0x126   :  { %p324_p9 = pnand %p322_p8, %p319_p7 }
 0x128   :  { %327 = shalt.err (!%p324_p9)
}
 0x129   :  { %s341_s20 = smov 128   ;;  %s342_s21 = smov 8  }
 0x12a   :  { %198 = dma.vmem_to_hbm [thread:$0]  %s193_s12, 256, %s405_s3, [#allocation4], %s341_s20, %s341_s20, %s342_s21  }
 0x12b   :  { %332 = dma.done.wait [#allocation4], 256  }
 0x12c   :  { %333 = vsyncadd [#allocation4], 4294967040 }
 0x12d   :  { %202 = vsyncpa [#allocation3], 1 }
 0x12e   :  { %203 = vsyncpa [#allocation6], 1 }
 0x12f   :  { %204 = vsyncpa [#allocation4], 1 }

</bundles_post_ra>
